<compile_context>
chip_gen: v7x
topology: tpu7x:2x2x1
jax: 0.10.0
libtpu: 0.0.40
codegen_flags: <defaults>
</compile_context>

<pallas_src>
import functools

import jax
import jax.numpy as jnp
from jax.experimental import pallas as pl
from jax.experimental.pallas import tpu as pltpu

LANES = 128
_SUBLANE_MULT = 32            # sublane-aligned block rows for f32/bf16/int8 alike
_PER_STEP_HEADROOM = 4 << 20  # VMEM slack on top of the double-buffered blocks
_SPLIT_BYTES = 2 << 20        # slabs >= 2 MiB get >= 2 blocks (one per v7x TC)


def _relu_kernel(x_ref, o_ref):
    # Elementwise max(x, 0) on the current VMEM tile (VPU path).
    x = x_ref[...]
    o_ref[...] = jnp.maximum(x, jnp.zeros((), dtype=x.dtype))


def _round_up(a: int, m: int) -> int:
    return ((a + m - 1) // m) * m


@functools.lru_cache(maxsize=1)
def _vmem_capacity_bytes() -> int:
    """Physical VMEM per TensorCore; conservative default if query fails."""
    try:
        return int(pltpu.get_tpu_info().vmem_capacity_bytes)
    except Exception:
        return 64 << 20  # v7x-sized worst case


def _default_tile_rows() -> int:
    # 8 MiB f32 blocks on 128 MiB parts (v5e/v6e), 4 MiB on 64 MiB parts (v7x).
    return 16384 if _vmem_capacity_bytes() >= (128 << 20) else 8192


def _relu_slab(slab: jax.Array, tile_rows: int, donate: bool) -> jax.Array:
    """Run the Pallas kernel over a [rows, 128] slab."""
    rows = slab.shape[0]
    itemsize = slab.dtype.itemsize
    vmem_budget = (_vmem_capacity_bytes() * 3) // 4  # generation-aware cap

    # Largest block whose (1 in + 1 out) x 2 pipeline buffers fit the budget.
    max_tr = (vmem_budget - _PER_STEP_HEADROOM) // (4 * LANES * itemsize)
    max_tr = max(_SUBLANE_MULT, (max_tr // _SUBLANE_MULT) * _SUBLANE_MULT)
    tile_rows = max(_SUBLANE_MULT, min(tile_rows, max_tr))

    slab_bytes = rows * LANES * itemsize
    if rows <= tile_rows:
        # Single-block slab: split in two if it is big enough that leaving one
        # v7x TensorCore idle would cost real bandwidth.
        g_target = 2 if slab_bytes >= _SPLIT_BYTES else 1
    else:
        g_target = pl.cdiv(rows, tile_rows)
        if g_target % 2 == 1:
            g_target += 1  # even step count -> balanced across 2 TCs

    if g_target == 1:
        tr = rows  # full-extent block is always layout-legal
    else:
        tr = min(rows, _round_up(pl.cdiv(rows, g_target), _SUBLANE_MULT))

    grid = (pl.cdiv(rows, tr),)  # ragged last block is masked by Pallas

    block_bytes = tr * LANES * itemsize
    vmem_bytes = int(min(max(4 * block_bytes + _PER_STEP_HEADROOM, 16 << 20),
                         vmem_budget))

    n_elems = rows * LANES
    cost = pl.CostEstimate(flops=n_elems, transcendentals=0,
                           bytes_accessed=2 * n_elems * itemsize)

    return pl.pallas_call(
        _relu_kernel,
        out_shape=jax.ShapeDtypeStruct((rows, LANES), slab.dtype),
        grid_spec=pltpu.PrefetchScalarGridSpec(
            num_scalar_prefetch=0,
            grid=grid,
            in_specs=[pl.BlockSpec((tr, LANES), lambda i: (i, 0))],
            out_specs=pl.BlockSpec((tr, LANES), lambda i: (i, 0)),
        ),
        compiler_params=pltpu.CompilerParams(
            dimension_semantics=("parallel",),
            vmem_limit_bytes=vmem_bytes,
        ),
        cost_estimate=cost,
        # Block i's writeback and block i+1's read target disjoint regions,
        # so in-place aliasing is safe with this BlockSpec pattern.
        input_output_aliases=({0: 0} if donate else {}),
    )(slab)


def relu(x: jax.Array, *, tile_rows=None,
         min_pallas_elems: int = 64 * 1024, donate: bool = False) -> jax.Array:
    """ReLU over an arbitrary-shaped array via a Pallas TPU kernel."""
    orig_shape = x.shape
    n = x.size

    # Tiny inputs: a fused XLA elementwise beats a pallas_call launch.
    if n == 0 or n < min_pallas_elems or n < LANES:
        return jnp.maximum(x, jnp.zeros((), dtype=x.dtype))

    if tile_rows is None:
        tile_rows = _default_tile_rows()

    if n % LANES == 0:
        slab = x.reshape(n // LANES, LANES)
        return _relu_slab(slab, tile_rows, donate).reshape(orig_shape)

    # Lane-ragged total size: Pallas on the 128-aligned head, XLA on the
    # (<128-element) tail.  Donation is skipped (concat would break aliasing).
    n_head = (n // LANES) * LANES
    flat = x.reshape(-1)
    head = _relu_slab(flat[:n_head].reshape(n_head // LANES, LANES),
                      tile_rows, donate=False).reshape(-1)
    tail = jnp.maximum(flat[n_head:], jnp.zeros((), dtype=x.dtype))
    return jnp.concatenate([head, tail]).reshape(orig_shape)


if __name__ == "__main__":
    key = jax.random.PRNGKey(0)
    k1, k2, k3 = jax.random.split(key, 3)

    # Small NCHW activation (2*4*16*16 = 2048 elems). Force the Pallas path
    # so the kernel is exercised even below the default size gate.
    x = jax.random.normal(k1, (2, 4, 16, 16), dtype=jnp.float32)
    y = relu(x, min_pallas_elems=0)
    jax.block_until_ready(y)
    ref = jnp.maximum(x, 0.0)
    assert y.shape == x.shape and y.dtype == x.dtype
    assert jnp.allclose(y, ref), "mismatch vs reference (small / pallas)"

    # Default gated path for the tiny input (fused XLA fallback).
    assert jnp.allclose(relu(x), ref), "mismatch vs reference (fallback)"

    # Lane-ragged total size (2*4*17*17 = 2312, tail of 8 elements):
    # exercises the Pallas-head + XLA-tail path.
    x_rag = jax.random.normal(k3, (2, 4, 17, 17), dtype=jnp.float32)
    y_rag = relu(x_rag, min_pallas_elems=0)
    jax.block_until_ready(y_rag)
    assert jnp.allclose(y_rag, jnp.maximum(x_rag, 0.0)), "mismatch (ragged n)"

    # Larger input: 2*64*33*33 = 139392 elems = 1089 rows of 128.  With
    # tile_rows=256 the odd grid (5) is rounded to an even one (6) and the
    # last block is partial -> exercises the even-grid + masked-tail paths.
    x_big = jax.random.normal(k2, (2, 64, 33, 33), dtype=jnp.float32)
    y_big = relu(x_big, tile_rows=256)
    jax.block_until_ready(y_big)
    assert jnp.allclose(y_big, jnp.maximum(x_big, 0.0)), "mismatch (big f32)"

    # bf16 path (same kernel, half the HBM traffic).
    x_bf = x_big.astype(jnp.bfloat16)
    y_bf = relu(x_bf, tile_rows=256)
    jax.block_until_ready(y_bf)
    assert y_bf.dtype == jnp.bfloat16
    assert jnp.array_equal(y_bf, jnp.maximum(x_bf, jnp.bfloat16(0))), "mismatch (bf16)"

    # In-place (donated) variant via input_output_aliases under jit.
    relu_inplace = jax.jit(
        functools.partial(relu, donate=True, min_pallas_elems=0),
        donate_argnums=0)
    x_don = jnp.array(x_big)               # fresh buffer we can donate
    ref_don = jnp.maximum(x_don, 0.0)      # reference computed before donation
    y_don = relu_inplace(x_don)
    jax.block_until_ready(y_don)
    assert jnp.allclose(y_don, ref_don), "mismatch (donated / in-place)"

    print("KERNEL_OK")
</pallas_src>

<mosaic_0001>
module attributes {stable_mosaic.version = 11 : i64} {
  func.func @_relu_kernel(%arg0: i32, %arg1: memref<16x128xf32, #tpu.memory_space<vmem>>, %arg2: memref<16x128xf32, #tpu.memory_space<vmem>>) attributes {dimension_semantics = [#tpu.dimension_semantics<parallel>], iteration_bounds = array<i64: 1>, scalar_prefetch = 0 : i64, scratch_operands = 0 : i64, tpu.core_type = #tpu.core_type<tc>, window_params = [{transform_indices = @transform_0, window_bounds = array<i64: 16, 128>}, {transform_indices = @transform_1, window_bounds = array<i64: 16, 128>}]} {
    %c0 = arith.constant 0 : index
    %c0_0 = arith.constant 0 : index
    %0 = vector.load %arg1[%c0, %c0_0] : memref<16x128xf32, #tpu.memory_space<vmem>>, vector<16x128xf32>
    %cst = arith.constant 0.000000e+00 : f32
    %1 = vector.broadcast %cst : f32 to vector<16x128xf32>
    %2 = arith.maximumf %0, %1 : vector<16x128xf32>
    %c0_1 = arith.constant 0 : index
    %c0_2 = arith.constant 0 : index
    %3 = vector.load %arg2[%c0_1, %c0_2] : memref<16x128xf32, #tpu.memory_space<vmem>>, vector<16x128xf32>
    tpu.vector_store %arg2[%c0_1, %c0_2], %2 {strides = array<i32>} : memref<16x128xf32, #tpu.memory_space<vmem>>, vector<16x128xf32>,
    return
  }
  func.func @transform_0(%arg0: i32) -> (i32, i32) {
    %c0_i32 = arith.constant 0 : i32
    %c0_i32_0 = arith.constant 0 : i32
    return %arg0, %c0_i32 : i32, i32
  }
  func.func @transform_1(%arg0: i32) -> (i32, i32) {
    %c0_i32 = arith.constant 0 : i32
    %c0_i32_0 = arith.constant 0 : i32
    return %arg0, %c0_i32 : i32, i32
  }
}

</mosaic_0001>

<bundles_post_ra>
// kernel: tpu_custom_call.1
= control target key start
LH: loop header
LB: loop body
LE: loop exit
PB: predicated region body
PF: predicated region fallthrough
CT: control target
= control target key end

     0   :  { %6 = vsyncpa [#allocation3], 0  ;;  %s136_s0 = inlined_call_operand.hbm [shape: f32[16,128], index: 0, kind: input, shape index: {}]   ;;  %s137_s1 = inlined_call_operand.hbm [shape: f32[16,128], index: 1, kind: output, shape index: {}]  }
   0x1   :  { %7 = vsyncpa [#allocation4], 0  ;;  %s98_s6 = smov [#allocation2]   ;;  %s50_s10 = scalar_lea.hbm %s136_s0, 256 }
   0x2   :  { %s13_s7 = sshll.u32 %s98_s6, 4  ;;  %p51_p0 = scmp.ne.s32.totalorder %s136_s0, %s50_s10  ;;  %s14_s7 = int_to_ptr.vmem [resolvable:$true] %s13_s7 }
   0x3   :  { %p54_p1 = scmp.lt.u32.totalorder %s50_s10, %s136_s0 }
   0x5   :  { %p56_p2 = pnand %p54_p1, %p51_p0 }
   0x7   :  { %59 = shalt.err (!%p56_p2)
}
   0x8   :  { %s60_s15 = scalar_lea.vmem %s14_s7, 256  ;;  %p65_p4 = scmp.lt.s32.totalorder %s14_s7, %s14_s7 }
   0x9   :  { %p61_p3 = scmp.ne.s32.totalorder %s14_s7, %s60_s15  ;;  %p66_p5 = scmp.lt.s32.totalorder %s60_s15, %s60_s15 }
   0xb   :  { %p67_p6 = por %p66_p5, %p65_p4 }
   0xd   :  { %p68_p7 = pnand %p67_p6, %p61_p3 }
   0xf   :  { %71 = shalt.err (!%p68_p7)
}
  0x10   :  { %s99_s16 = smov 128   ;;  %s100_s17 = smov 8  }
  0x11   :  { %19 = dma.hbm_to_vmem [thread:$0]  %s136_s0, 256, %s14_s7, [#allocation3], %s99_s16, %s99_s16, %s100_s17  }
  0x12   :  { %94 = dma.done.wait [#allocation3], 256  }
  0x13   :  { %95 = vsyncadd [#allocation3], 4294967040  ;;  %s101_s20 = smov [#allocation5]   ;;  %v23_v0 = vld [vmem:[#allocation2] sm:$0xff]  ;;  %v24_v1 = vld [vmem:[#allocation2 + $0x8] sm:$0xff] }
  0x14   :  { %s34_s21 = sshll.u32 %s101_s20, 4  ;;  %v25_v2 = vmax.f32 %v23_v0, 0.0  ;;  %v26_v3 = vmax.f32 %v24_v1, 0.0  ;;  %s35_s21 = int_to_ptr.vmem [resolvable:$true] %s34_s21 }
  0x15   :  { %s72_s22 = scalar_lea.vmem %s35_s21, 256  ;;  %p77_p9 = scmp.lt.s32.totalorder %s35_s21, %s35_s21 }
  0x16   :  { %27 = vst [vmem:[#allocation5] sm:$0xff] %v25_v2  ;;  %28 = vst [vmem:[#allocation5 + $0x8] sm:$0xff] %v26_v3  ;;  %p73_p8 = scmp.ne.s32.totalorder %s35_s21, %s72_s22  ;;  %p78_p10 = scmp.lt.s32.totalorder %s72_s22, %s72_s22 }
  0x18   :  { %p79_p11 = por %p78_p10, %p77_p9 }
  0x1a   :  { %p80_p12 = pnand %p79_p11, %p73_p8 }
  0x1c   :  { %83 = shalt.err (!%p80_p12)
}
  0x1d   :  { %s84_s24 = scalar_lea.hbm %s137_s1, 256 }
  0x1e   :  { %p85_p13 = scmp.ne.s32.totalorder %s137_s1, %s84_s24  ;;  %p88_p0 = scmp.lt.u32.totalorder %s84_s24, %s137_s1 }
  0x20   :  { %p90_p1 = pnand %p88_p0, %p85_p13 }
  0x22   :  { %93 = shalt.err (!%p90_p1)
}
  0x23   :  { %40 = dma.vmem_to_hbm [thread:$0]  %s35_s21, 256, %s137_s1, [#allocation4], %s99_s16, %s99_s16, %s100_s17  }
  0x24   :  { %96 = dma.done.wait [#allocation4], 256  }
  0x25   :  { %97 = vsyncadd [#allocation4], 4294967040 }
  0x26   :  { %44 = vsyncpa [#allocation3], 1 }
  0x27   :  { %45 = vsyncpa [#allocation4], 1 }

</bundles_post_ra>
